<compile_context>
chip_gen: v6e
topology: v6e:2x2x1
jax: 0.10.0
libtpu: 0.0.40
codegen_flags: <defaults>
</compile_context>

<pallas_src>
import math
from functools import lru_cache, partial

import jax
import jax.numpy as jnp
from jax.experimental import pallas as pl
from jax.experimental.pallas import tpu as pltpu

ROW_TILE = 128                    # output-row tile (raise to 256-512 for production N)
LANE = 128                        # matmul outputs padded to multiples of the lane width
VMEM_LIMIT = 32 * 1024 * 1024     # explicit scoped-VMEM budget (safe on v5e/v6e/v7x)


def _round_up(x, m):
    return (x + m - 1) // m * m


# ----------------------------------------------------------------------------
# Pallas kernels
# ----------------------------------------------------------------------------
def _bn_silu_kernel(x_ref, scale_ref, shift_ref, o_ref):
    # normalize (scale/shift precomputed from global stats) + SiLU, all f32 on the VPU.
    xn = x_ref[...] * scale_ref[...] + shift_ref[...]
    o_ref[...] = (xn * jax.nn.sigmoid(xn)).astype(o_ref.dtype)


@lru_cache(maxsize=None)
def _bn_silu_call(n_pad, c):
    return pl.pallas_call(
        _bn_silu_kernel,
        out_shape=jax.ShapeDtypeStruct((n_pad, c), jnp.float32),
        grid_spec=pltpu.PrefetchScalarGridSpec(
            num_scalar_prefetch=0,
            grid=(n_pad // ROW_TILE,),
            in_specs=[pl.BlockSpec((ROW_TILE, c), lambda i: (i, 0)),
                      pl.BlockSpec((1, c), lambda i: (0, 0)),
                      pl.BlockSpec((1, c), lambda i: (0, 0))],
            out_specs=pl.BlockSpec((ROW_TILE, c), lambda i: (i, 0)),
        ),
        compiler_params=pltpu.CompilerParams(
            dimension_semantics=("parallel",),
            vmem_limit_bytes=VMEM_LIMIT),
    )


def bn_silu(x, gamma, beta):
    """Training-mode BatchNorm1d (global stats over all rows) followed by SiLU."""
    n, c = x.shape
    mean = jnp.mean(x, axis=0)              # global stats computed in XLA
    var = jnp.var(x, axis=0)
    scale = gamma * jax.lax.rsqrt(var + 1e-5)
    shift = beta - mean * scale
    n_pad = _round_up(n, ROW_TILE)
    x_p = jnp.zeros((n_pad, c), jnp.float32).at[:n].set(x.astype(jnp.float32))
    out = _bn_silu_call(n_pad, c)(x_p, scale.reshape(1, c), shift.reshape(1, c))
    return out[:n]


def _linear_kernel(silu_in, x_ref, w_ref, b_ref, o_ref):
    x = x_ref[...]                            # bf16
    if silu_in:
        xf = x.astype(jnp.float32)
        x = (xf * jax.nn.sigmoid(xf)).astype(jnp.bfloat16)
    o_ref[...] = (jnp.dot(x, w_ref[...], preferred_element_type=jnp.float32)
                  + b_ref[...])


@lru_cache(maxsize=None)
def _linear_call(silu_in, n_pad, cin, cout_pad):
    return pl.pallas_call(
        partial(_linear_kernel, silu_in),
        out_shape=jax.ShapeDtypeStruct((n_pad, cout_pad), jnp.float32),
        grid_spec=pltpu.PrefetchScalarGridSpec(
            num_scalar_prefetch=0,
            grid=(n_pad // ROW_TILE,),
            in_specs=[pl.BlockSpec((ROW_TILE, cin), lambda i: (i, 0)),
                      pl.BlockSpec((cin, cout_pad), lambda i: (0, 0)),
                      pl.BlockSpec((1, cout_pad), lambda i: (0, 0))],
            out_specs=pl.BlockSpec((ROW_TILE, cout_pad), lambda i: (i, 0)),
        ),
        compiler_params=pltpu.CompilerParams(
            dimension_semantics=("parallel",),
            vmem_limit_bytes=VMEM_LIMIT),
    )


def linear(x, w, b=None, silu_in=False):
    """Row-tiled Linear (optional SiLU on the input), bf16 MXU, lane-dense output."""
    n, cin = x.shape
    cout = w.shape[1]
    cout_pad = _round_up(cout, LANE)
    if b is None:
        b = jnp.zeros((cout,), jnp.float32)
    w_p = jnp.zeros((cin, cout_pad), jnp.bfloat16).at[:, :cout].set(
        w.astype(jnp.bfloat16))
    b_p = jnp.zeros((1, cout_pad), jnp.float32).at[:, :cout].set(
        b.reshape(1, cout).astype(jnp.float32))
    n_pad = _round_up(n, ROW_TILE)
    x_p = jnp.zeros((n_pad, cin), jnp.bfloat16).at[:n].set(x.astype(jnp.bfloat16))
    out = _linear_call(bool(silu_in), n_pad, cin, cout_pad)(x_p, w_p, b_p)
    return out[:n, :cout]


def _spconv_kernel(idx_ref, feat_ref, w_ref, b_ref, o_ref):
    # Fused (one-hot MXU gather) + matmul sparse conv.
    #   grid     = (row_tiles ["parallel"], K ["arbitrary"])
    #   idx_ref  : [1, ROW_TILE, 1] int32 neighbor indices for (kernel offset k, tile i)
    #   feat_ref : VMEM-resident [n_in_pad, cin] bf16 (zero sentinel rows at the end)
    #   w_ref    : VMEM-resident [K, cin, cout_pad] bf16, sliced per kernel offset
    #   b_ref    : [1, cout_pad] f32 (constant block, added only in the epilogue)
    #   o_ref    : [ROW_TILE, cout_pad] f32, resident across k -> used as accumulator
    k = pl.program_id(1)

    @pl.when(k == 0)
    def _():
        o_ref[...] = jnp.zeros_like(o_ref)

    idx_col = idx_ref[0]                                        # [ROW_TILE, 1] int32
    n_in_pad = feat_ref.shape[0]
    sel = (idx_col == jax.lax.broadcasted_iota(
        jnp.int32, (ROW_TILE, n_in_pad), 1)).astype(jnp.bfloat16)
    g = jnp.dot(sel, feat_ref[...], preferred_element_type=jnp.float32)
    o_ref[...] += jnp.dot(g.astype(jnp.bfloat16), w_ref[k],
                          preferred_element_type=jnp.float32)

    @pl.when(k == pl.num_programs(1) - 1)
    def _():
        o_ref[...] += b_ref[...]


@lru_cache(maxsize=None)
def _spconv_call(K, n_in_pad, n_out_pad, cin, cout_pad):
    return pl.pallas_call(
        _spconv_kernel,
        out_shape=jax.ShapeDtypeStruct((n_out_pad, cout_pad), jnp.float32),
        grid_spec=pltpu.PrefetchScalarGridSpec(
            num_scalar_prefetch=0,
            grid=(n_out_pad // ROW_TILE, K),
            in_specs=[
                pl.BlockSpec((1, ROW_TILE, 1), lambda i, k: (k, i, 0)),
                pl.BlockSpec((n_in_pad, cin), lambda i, k: (0, 0)),
                pl.BlockSpec((K, cin, cout_pad), lambda i, k: (0, 0, 0)),
                pl.BlockSpec((1, cout_pad), lambda i, k: (0, 0)),
            ],
            out_specs=pl.BlockSpec((ROW_TILE, cout_pad), lambda i, k: (i, 0)),
        ),
        compiler_params=pltpu.CompilerParams(
            dimension_semantics=("parallel", "arbitrary"),
            vmem_limit_bytes=VMEM_LIMIT),
    )


def sparse_conv(feats, idx, weight, bias=None):
    """Sparse 3-D conv: out[j] = sum_k feats[idx[k, j]] @ W[k] (+ bias).

    idx entries equal to feats.shape[0] mean "missing neighbor" (maps to a zero row).
    """
    n_in, cin = feats.shape
    K, n_out = idx.shape
    cout = weight.shape[2]
    cout_pad = _round_up(cout, LANE)
    if bias is None:
        bias = jnp.zeros((cout,), jnp.float32)
    w_p = jnp.zeros((K, cin, cout_pad), jnp.bfloat16).at[:, :, :cout].set(
        weight.astype(jnp.bfloat16))
    b_p = jnp.zeros((1, cout_pad), jnp.float32).at[:, :cout].set(
        bias.reshape(1, cout).astype(jnp.float32))
    n_in_pad = _round_up(n_in + 1, LANE)     # +1 zero sentinel row, lane/MXU aligned
    f_p = jnp.zeros((n_in_pad, cin), jnp.bfloat16).at[:n_in].set(
        feats.astype(jnp.bfloat16))
    n_out_pad = _round_up(n_out, ROW_TILE)
    idx_p = jnp.full((K, n_out_pad, 1), n_in, jnp.int32).at[:, :n_out, 0].set(
        idx.astype(jnp.int32))
    out = _spconv_call(K, n_in_pad, n_out_pad, cin, cout_pad)(idx_p, f_p, w_p, b_p)
    return out[:n_out, :cout]


# ----------------------------------------------------------------------------
# Sparse-tensor glue (eager JAX): coordinate hashing, kernel maps (built once/level)
# ----------------------------------------------------------------------------
def _build_lookup(coords, margin):
    """Exact integer key of (b, x, y, z) with data-derived radices (no aliasing).

    Eager/host-side only (uses concrete min/max to build Python-int radices).
    """
    c = jnp.asarray(coords, jnp.int32)
    lo = [int(v) - margin for v in c[:, 1:].min(axis=0)]
    hi = [int(v) + margin for v in c[:, 1:].max(axis=0)]
    dims = [h - l + 1 for h, l in zip(hi, lo)]
    nb = int(c[:, 0].max()) + 1
    assert nb * dims[0] * dims[1] * dims[2] < 2 ** 31, "coordinate key overflows int32"

    def key_of(q):
        k = q[:, 0]
        for a in range(3):
            k = k * dims[a] + (q[:, 1 + a] - lo[a])
        return k

    keys = key_of(c)
    order = jnp.argsort(keys)
    skeys = keys[order]
    n = c.shape[0]

    def lookup(q):
        sh = q.shape[:-1]
        qf = q.reshape(-1, 4).astype(jnp.int32)
        in_rng = jnp.ones((qf.shape[0],), bool)
        for a in range(3):
            in_rng &= (qf[:, 1 + a] >= lo[a]) & (qf[:, 1 + a] <= hi[a])
        qk = key_of(qf)
        pos = jnp.clip(jnp.searchsorted(skeys, qk), 0, n - 1)
        hit = in_rng & (skeys[pos] == qk)
        return jnp.where(hit, order[pos], n).reshape(sh)   # n == "missing" sentinel

    return lookup


def _offsets(ks, stride):
    r = (-stride, 0, stride) if ks == 3 else (0, stride)
    return jnp.asarray([(a, b, c) for a in r for b in r for c in r], jnp.int32)


def _neighbor_idx(out_coords, offsets, lookup):
    K = offsets.shape[0]
    n = out_coords.shape[0]
    q = jnp.concatenate(
        [jnp.broadcast_to(out_coords[None, :, :1], (K, n, 1)),
         out_coords[None, :, 1:] + offsets[:, None, :]], axis=-1)
    return lookup(q)                                        # [K, n_out]


def _upconv_idx(coarse_lookup, n_coarse, fine_coords, fine_stride):
    # Transposed ks=2, stride=2 conv: each fine voxel pulls from its unique parent.
    s = fine_stride
    parent_sp = (fine_coords[:, 1:] // (2 * s)) * (2 * s)
    parent = jnp.concatenate([fine_coords[:, :1], parent_sp], axis=1)
    pidx = coarse_lookup(parent)                            # [N_fine]
    pat = (fine_coords[:, 1:] - parent_sp) // s
    kof = pat[:, 0] * 4 + pat[:, 1] * 2 + pat[:, 2]
    return jnp.where(kof[None, :] == jnp.arange(8, dtype=kof.dtype)[:, None],
                     pidx[None, :], n_coarse).astype(jnp.int32)   # [8, N_fine]


def precompute_levels(vox_coords, n_levels):
    """Build coordinates + every kernel map once per resolution level (reused by
    all res-blocks / down / up convs at that level)."""
    levels = []
    coords = vox_coords
    stride = 1
    for l in range(n_levels):
        lookup = _build_lookup(coords, margin=2 * stride)
        lvl = {"coords": coords, "stride": stride, "n": coords.shape[0],
               "lookup": lookup,
               "idx27": _neighbor_idx(coords, _offsets(3, stride), lookup)}
        if l < n_levels - 1:
            ds = (coords[:, 1:] // (2 * stride)) * (2 * stride)
            nxt = jnp.unique(jnp.concatenate([coords[:, :1], ds], axis=1), axis=0)
            lvl["idx_down"] = _neighbor_idx(nxt, _offsets(2, stride), lookup)
            levels.append(lvl)
            coords = nxt
            stride *= 2
        else:
            levels.append(lvl)
    for l in range(n_levels - 1):        # up maps: coarse level l+1 -> fine level l
        coarse, fine = levels[l + 1], levels[l]
        levels[l]["idx_up"] = _upconv_idx(
            coarse["lookup"], coarse["n"], fine["coords"], fine["stride"])
    return levels


def initial_voxelize(pt_feats, pt_coords_f, voxel_size):
    # TODO(synk): torchsparse also re-hashes at `pres`; direct voxelization here.
    vc = jnp.floor(pt_coords_f[:, 1:] / voxel_size).astype(jnp.int32)
    coords = jnp.concatenate([pt_coords_f[:, :1].astype(jnp.int32), vc], axis=1)
    vox_coords, inv = jnp.unique(coords, axis=0, return_inverse=True)
    inv = inv.reshape(-1)
    n_vox = vox_coords.shape[0]
    summed = jnp.zeros((n_vox, pt_feats.shape[1]), jnp.float32).at[inv].add(pt_feats)
    counts = jnp.zeros((n_vox,), jnp.float32).at[inv].add(1.0)
    return summed / counts[:, None], vox_coords, inv


def timestep_embedding(t, dim, max_period=10000.0):
    half = dim // 2
    freqs = jnp.exp(-math.log(max_period) * jnp.arange(half, dtype=jnp.float32) / half)
    args = t.astype(jnp.float32)[:, None] * freqs[None, :]
    return jnp.concatenate([jnp.cos(args), jnp.sin(args)], axis=-1)


# ----------------------------------------------------------------------------
# Blocks
# ----------------------------------------------------------------------------
def emb_res_block(p, feats, idx27, batch_idx, emb):
    # unet_conv: BN -> SiLU -> SpConv3d(ks=3)
    h = bn_silu(feats, p["bn1_g"], p["bn1_b"])
    h = sparse_conv(h, idx27, p["conv1_w"], p["conv1_b"])
    # TimeEmbeddingBlock: add Linear(SiLU(emb)) per batch index (x.C[:, 0]).
    temb = linear(emb, p["temb_w"], p["temb_b"], silu_in=True)          # [B, nf]
    h = h + temb[batch_idx]
    h2 = bn_silu(h, p["bn2_g"], p["bn2_b"])
    h2 = sparse_conv(h2, idx27, p["conv2_w"], p["conv2_b"])
    if p["idconv_w"] is not None:
        skip = linear(feats, p["idconv_w"], p["idconv_b"])
    else:
        skip = feats
    return h2 + skip


# ----------------------------------------------------------------------------
# Parameter initialization (deterministic, synthetic)
# ----------------------------------------------------------------------------
class _PGen:
    def __init__(self, key):
        self.key = key

    def n(self, *shape, scale=0.02):
        self.key, sub = jax.random.split(self.key)
        return scale * jax.random.normal(sub, shape, jnp.float32)


def _init_resblock(g, n_emb, ni, nf):
    return dict(
        bn1_g=jnp.ones((ni,), jnp.float32), bn1_b=jnp.zeros((ni,), jnp.float32),
        conv1_w=g.n(27, ni, nf), conv1_b=jnp.zeros((nf,), jnp.float32),
        temb_w=g.n(n_emb, nf), temb_b=jnp.zeros((nf,), jnp.float32),
        bn2_g=jnp.ones((nf,), jnp.float32), bn2_b=jnp.zeros((nf,), jnp.float32),
        conv2_w=g.n(27, nf, nf), conv2_b=jnp.zeros((nf,), jnp.float32),
        idconv_w=None if ni == nf else g.n(ni, nf),
        idconv_b=None if ni == nf else jnp.zeros((nf,), jnp.float32),
    )


def init_params(key, in_ch, nfs):
    g = _PGen(key)
    n_temb = nfs[0]
    n_emb = 4 * n_temb
    in_ch_pad = _round_up(in_ch, 8)          # pad degenerate Cin for the MXU
    conv_in_w = g.n(27, in_ch_pad, nfs[0]).at[:, in_ch:, :].set(0.0)
    params = {
        "conv_in_w": conv_in_w,
        "emb_bn_g": jnp.ones((n_temb,), jnp.float32),
        "emb_bn_b": jnp.zeros((n_temb,), jnp.float32),
        "emb_w1": g.n(n_temb, n_emb), "emb_b1": jnp.zeros((n_emb,), jnp.float32),
        "emb_w2": g.n(n_emb, n_emb), "emb_b2": jnp.zeros((n_emb,), jnp.float32),
    }
    downs, nf = [], nfs[0]
    for i in range(len(nfs)):
        ni, nf = nf, nfs[i]
        blk = {"res": _init_resblock(g, n_emb, ni, nf)}
        if i != len(nfs) - 1:
            blk["down_w"] = g.n(8, nf, nf)
        downs.append(blk)
    params["downs"] = downs
    params["mid"] = _init_resblock(g, n_emb, nfs[-1], nfs[-1])
    ups, rev, nf = [], list(reversed(nfs)), list(reversed(nfs))[0]
    for i in range(len(nfs)):
        prev_nf, nf = nf, rev[i]
        ni = rev[min(i + 1, len(nfs) - 1)]
        blk = {"res0": _init_resblock(g, n_emb, prev_nf + nf, nf),
               "res1": _init_resblock(g, n_emb, nf + ni, nf)}
        if i != len(nfs) - 1:
            blk["up_w"] = g.n(8, nf, nf)
        ups.append(blk)
    params["ups"] = ups
    params["out_bn_g"] = jnp.ones((nfs[0],), jnp.float32)
    params["out_bn_b"] = jnp.zeros((nfs[0],), jnp.float32)
    params["out_w"] = g.n(nfs[0], 3)
    return params


# ----------------------------------------------------------------------------
# Full SPVUnet forward
# ----------------------------------------------------------------------------
def spv_unet_forward(params, pt_feats, pt_coords, t, voxel_size, nfs):
    n_temb = nfs[0]

    # emb_mlp: lin(n_temb, n_emb, norm=BN1d) -> lin(n_emb, n_emb)
    temb = timestep_embedding(t, n_temb)
    e = bn_silu(temb, params["emb_bn_g"], params["emb_bn_b"])
    e = linear(e, params["emb_w1"], params["emb_b1"])
    emb = linear(e, params["emb_w2"], params["emb_b2"], silu_in=True)

    vox_feats, vox_coords, inv = initial_voxelize(pt_feats, pt_coords, voxel_size)
    levels = precompute_levels(vox_coords, len(nfs))

    # conv_in: SpConv3d(in_ch, nfs[0], ks=3, padding=1) — coords preserved.
    in_pad = params["conv_in_w"].shape[1]
    vf = jnp.zeros((vox_feats.shape[0], in_pad), jnp.float32).at[
        :, :vox_feats.shape[1]].set(vox_feats)
    x = sparse_conv(vf, levels[0]["idx27"], params["conv_in_w"], None)

    saved = [x]
    lvl = 0
    # Down path
    for blk in params["downs"]:
        L = levels[lvl]
        x = emb_res_block(blk["res"], x, L["idx27"], L["coords"][:, 0], emb)
        saved.append(x)
        if "down_w" in blk:
            x = sparse_conv(x, L["idx_down"], blk["down_w"], None)
            lvl += 1
            saved.append(x)

    # Mid block
    L = levels[lvl]
    x = emb_res_block(params["mid"], x, L["idx27"], L["coords"][:, 0], emb)

    # Up path
    for blk in params["ups"]:
        L = levels[lvl]
        for rk in ("res0", "res1"):
            skip_f = saved.pop()
            x = jnp.concatenate([x, skip_f], axis=1)          # torchsparse.cat
            x = emb_res_block(blk[rk], x, L["idx27"], L["coords"][:, 0], emb)
        if "up_w" in blk:
            x = sparse_conv(x, levels[lvl - 1]["idx_up"], blk["up_w"], None)
            lvl -= 1

    # voxel_to_point + conv_out (BN -> SiLU -> Linear, no bias)
    # TODO(synk): real SPVCNN uses trilinear devoxelization; nearest gather here.
    z1 = x[inv]
    out = bn_silu(z1, params["out_bn_g"], params["out_bn_b"])
    out = linear(out, params["out_w"])
    return out


# ----------------------------------------------------------------------------
if __name__ == "__main__":
    key = jax.random.PRNGKey(0)
    k1, k2, k3, k4 = jax.random.split(key, 4)

    B, N_per, L = 2, 64, 16.0
    nfs = (32, 64, 96, 128)     # small analog of (224, 448, 672, 896)

    pts = jax.random.uniform(k1, (B * N_per, 3), minval=0.0, maxval=L)
    batch = jnp.repeat(jnp.arange(B, dtype=jnp.float32), N_per)[:, None]
    pt_coords = jnp.concatenate([batch, pts], axis=1)           # [N, 4] (b,x,y,z)
    pt_feats = jax.random.normal(k2, (B * N_per, 3), jnp.float32)
    t = jax.random.randint(k3, (B,), 0, 1000).astype(jnp.float32)

    params = init_params(k4, in_ch=3, nfs=nfs)

    out = spv_unet_forward(params, pt_feats, pt_coords, t, voxel_size=1.0, nfs=nfs)
    out = jax.block_until_ready(out)

    assert out.shape == (B * N_per, 3), out.shape
    assert bool(jnp.all(jnp.isfinite(out)))
    print("KERNEL_OK")
</pallas_src>

<mosaic_0001>
module attributes {stable_mosaic.version = 11 : i64} {
  func.func @_bn_silu_kernel(%arg0: i32, %arg1: memref<128x32xf32, #tpu.memory_space<vmem>>, %arg2: memref<1x32xf32, #tpu.memory_space<vmem>>, %arg3: memref<1x32xf32, #tpu.memory_space<vmem>>, %arg4: memref<128x32xf32, #tpu.memory_space<vmem>>) attributes {dimension_semantics = [#tpu.dimension_semantics<parallel>], iteration_bounds = array<i64: 1>, scalar_prefetch = 0 : i64, scratch_operands = 0 : i64, tpu.core_type = #tpu.core_type<tc>, window_params = [{transform_indices = @transform_0, window_bounds = array<i64: 128, 32>}, {pipeline_mode = #tpu.pipeline_mode<synchronous>, transform_indices = @transform_1, window_bounds = array<i64: 1, 32>}, {pipeline_mode = #tpu.pipeline_mode<synchronous>, transform_indices = @transform_2, window_bounds = array<i64: 1, 32>}, {transform_indices = @transform_3, window_bounds = array<i64: 128, 32>}]} {
    %c0 = arith.constant 0 : index
    %c0_0 = arith.constant 0 : index
    %0 = vector.load %arg1[%c0, %c0_0] : memref<128x32xf32, #tpu.memory_space<vmem>>, vector<128x32xf32>
    %c0_1 = arith.constant 0 : index
    %c0_2 = arith.constant 0 : index
    %1 = vector.load %arg2[%c0_1, %c0_2] : memref<1x32xf32, #tpu.memory_space<vmem>>, vector<1x32xf32>
    %2 = vector.broadcast %1 : vector<1x32xf32> to vector<128x32xf32>
    %3 = arith.mulf %0, %2 : vector<128x32xf32>
    %c0_3 = arith.constant 0 : index
    %c0_4 = arith.constant 0 : index
    %4 = vector.load %arg3[%c0_3, %c0_4] : memref<1x32xf32, #tpu.memory_space<vmem>>, vector<1x32xf32>
    %5 = vector.broadcast %4 : vector<1x32xf32> to vector<128x32xf32>
    %6 = arith.addf %3, %5 : vector<128x32xf32>
    %7 = arith.negf %6 : vector<128x32xf32>
    %8 = math.exp %7 : vector<128x32xf32>
    %cst = arith.constant 1.000000e+00 : f32
    %9 = vector.broadcast %cst : f32 to vector<128x32xf32>
    %10 = arith.addf %9, %8 : vector<128x32xf32>
    %11 = arith.divf %9, %10 : vector<128x32xf32>
    %12 = arith.mulf %6, %11 : vector<128x32xf32>
    %c0_5 = arith.constant 0 : index
    %c0_6 = arith.constant 0 : index
    %13 = vector.load %arg4[%c0_5, %c0_6] : memref<128x32xf32, #tpu.memory_space<vmem>>, vector<128x32xf32>
    tpu.vector_store %arg4[%c0_5, %c0_6], %12 {strides = array<i32>} : memref<128x32xf32, #tpu.memory_space<vmem>>, vector<128x32xf32>,
    return
  }
  func.func @transform_0(%arg0: i32) -> (i32, i32) {
    %c0_i32 = arith.constant 0 : i32
    %c0_i32_0 = arith.constant 0 : i32
    return %arg0, %c0_i32 : i32, i32
  }
  func.func @transform_1(%arg0: i32) -> (i32, i32) {
    %c0_i32 = arith.constant 0 : i32
    %c0_i32_0 = arith.constant 0 : i32
    %c0_i32_1 = arith.constant 0 : i32
    return %c0_i32, %c0_i32_0 : i32, i32
  }
  func.func @transform_2(%arg0: i32) -> (i32, i32) {
    %c0_i32 = arith.constant 0 : i32
    %c0_i32_0 = arith.constant 0 : i32
    %c0_i32_1 = arith.constant 0 : i32
    return %c0_i32, %c0_i32_0 : i32, i32
  }
  func.func @transform_3(%arg0: i32) -> (i32, i32) {
    %c0_i32 = arith.constant 0 : i32
    %c0_i32_0 = arith.constant 0 : i32
    return %arg0, %c0_i32 : i32, i32
  }
}

</mosaic_0001>

<bundles_post_ra>
// kernel: tpu_custom_call.1
= control target key start
LH: loop header
LB: loop body
LE: loop exit
PB: predicated region body
PF: predicated region fallthrough
CT: control target
= control target key end

     0   :  { %vm188_vm0 = vcmask 261120   ;;  %s529_s0 = inlined_call_operand.vmem [shape: f32[128,32], index: 0, kind: input, shape index: {}]   ;;  %s530_s1 = inlined_call_operand.vmem [shape: f32[1,32], index: 1, kind: input, shape index: {}]   ;;  %s531_s2 = inlined_call_operand.vmem [shape: f32[1,32], index: 2, kind: input, shape index: {}]   ;;  %s532_s3 = inlined_call_operand.vmem [shape: f32[128,32], index: 3, kind: output, shape index: {}]  }
   0x1   :  { %v14_v0 = vld [vmem:[%s529_s0] sm:$0xff]  ;;  %v15_v4 = vld [vmem:[%s529_s0 + $0x8] sm:$0xff]  ;;  %v16_v5 = vld [vmem:[%s529_s0 + $0x10] sm:$0xff] }
   0x2   :  { %v317_v1 = vld [vmem:[%s530_s1] ss:$0 sm:$0xff]  ;;  %v17_v6 = vld [vmem:[%s529_s0 + $0x18] sm:$0xff]  ;;  %v19_v11 = vld [vmem:[%s529_s0 + $0x28] sm:$0xff] }
   0x3   :  { %v322_v2 = vld [vmem:[%s531_s2] ss:$0 sm:$0xff]  ;;  %v37_v3 = vmul.f32 %v317_v1, %v14_v0  ;;  %v38_v7 = vmul.f32 %v317_v1, %v15_v4  ;;  %v39_v8 = vmul.f32 %v317_v1, %v16_v5  ;;  %v40_v9 = vmul.f32 %v317_v1, %v17_v6  ;;  %v20_v12 = vld [vmem:[%s529_s0 + $0x30] sm:$0xff]  ;;  %v21_v17 = vld [vmem:[%s529_s0 + $0x38] sm:$0xff] }
   0x4   :  { %v18_v10 = vld [vmem:[%s529_s0 + $0x20] sm:$0xff]  ;;  %v42_v15 = vmul.f32 %v317_v1, %v19_v11  ;;  %v43_v16 = vmul.f32 %v317_v1, %v20_v12  ;;  %v44_v21 = vmul.f32 %v317_v1, %v21_v17  ;;  %v23_v23 = vld [vmem:[%s529_s0 + $0x48] sm:$0xff]  ;;  %v24_v24 = vld [vmem:[%s529_s0 + $0x50] sm:$0xff] }
   0x5   :  { %v347_v13 = vadd.f32 %v322_v2, %v37_v3  ;;  %v41_v14 = vmul.f32 %v317_v1, %v18_v10  ;;  %v356_v18 = vadd.f32 %v322_v2, %v38_v7  ;;  %v359_v19 = vadd.f32 %v322_v2, %v39_v8  ;;  %v22_v22 = vld [vmem:[%s529_s0 + $0x40] sm:$0xff]  ;;  %v25_v29 = vld [vmem:[%s529_s0 + $0x58] sm:$0xff]  ;;  %v27_v31 = vld [vmem:[%s529_s0 + $0x68] sm:$0xff] }
   0x6   :  { %v362_v20 = vadd.f32 %v322_v2, %v40_v9  ;;  %v379_v27 = vadd.f32 %v322_v2, %v42_v15  ;;  %v382_v28 = vadd.f32 %v322_v2, %v43_v16  ;;  %v26_v30 = vld [vmem:[%s529_s0 + $0x60] sm:$0xff]  ;;  %v397_v35 = vadd.f32 %v322_v2, %v44_v21  ;;  %v28_v51 = vld [vmem:[%s529_s0 + $0x70] sm:$0xff]  ;;  %v29_v52 = vld [vmem:[%s529_s0 + $0x78] sm:$0xff] }
   0x7   :  { %v211_v25 = vmul.f32 -1.442695, %v347_v13  ;;  %v376_v26 = vadd.f32 %v322_v2, %v41_v14  ;;  %v212_v32 = vmul.f32 -1.442695, %v356_v18  ;;  %v213_v33 = vmul.f32 -1.442695, %v359_v19 }
   0x8   :  { %v214_v34 = vmul.f32 -1.442695, %v362_v20  ;;  %v216_v37 = vmul.f32 -1.442695, %v379_v27  ;;  %v217_v38 = vmul.f32 -1.442695, %v382_v28  ;;  %v45_v40 = vmul.f32 %v317_v1, %v22_v22 }
   0x9   :  { %227 = vpow2.f32 %v211_v25  ;;  %v215_v36 = vmul.f32 -1.442695, %v376_v26  ;;  %v218_v39 = vmul.f32 -1.442695, %v397_v35  ;;  %v46_v41 = vmul.f32 %v317_v1, %v23_v23 }
   0xa   :  { %229 = vpow2.f32 %v212_v32  ;;  %v47_v42 = vmul.f32 %v317_v1, %v24_v24  ;;  %v48_v43 = vmul.f32 %v317_v1, %v25_v29  ;;  %v49_v44 = vmul.f32 %v317_v1, %v26_v30 }
   0xb   :  { %231 = vpow2.f32 %v213_v33  ;;  %v409_v45 = vadd.f32 %v322_v2, %v45_v40  ;;  %v412_v46 = vadd.f32 %v322_v2, %v46_v41  ;;  %v50_v47 = vmul.f32 %v317_v1, %v27_v31 }
   0xc   :  { %233 = vpow2.f32 %v214_v34  ;;  %v416_v48 = vadd.f32 %v322_v2, %v47_v42  ;;  %v419_v49 = vadd.f32 %v322_v2, %v48_v43  ;;  %v422_v50 = vadd.f32 %v322_v2, %v49_v44 }
   0xd   :  { %235 = vpow2.f32 %v215_v36  ;;  %v219_v53 = vmul.f32 -1.442695, %v409_v45  ;;  %v220_v54 = vmul.f32 -1.442695, %v412_v46  ;;  %v433_v55 = vadd.f32 %v322_v2, %v50_v47 }
   0xe   :  { %237 = vpow2.f32 %v216_v37  ;;  %v221_v56 = vmul.f32 -1.442695, %v416_v48  ;;  %v222_v57 = vmul.f32 -1.442695, %v419_v49  ;;  %v51_v58 = vmul.f32 %v317_v1, %v28_v51 }
   0xf   :  { %239 = vpow2.f32 %v217_v38  ;;  %v52_v59 = vmul.f32 %v317_v1, %v29_v52  ;;  %v223_v60 = vmul.f32 -1.442695, %v422_v50  ;;  %v224_v61 = vmul.f32 -1.442695, %v433_v55 }
  0x10   :  { %241 = vpow2.f32 %v218_v39  ;;  %v442_v62 = vadd.f32 %v322_v2, %v51_v58 }
  0x11   :  { %243 = vpow2.f32 %v219_v53  ;;  %v445_v63 = vadd.f32 %v322_v2, %v52_v59 }
  0x12   :  { %245 = vpow2.f32 %v220_v54  ;;  %v225_v0 = vmul.f32 -1.442695, %v442_v62 }
  0x13   :  { %247 = vpow2.f32 %v221_v56  ;;  %v226_v3 = vmul.f32 -1.442695, %v445_v63 }
  0x14   :  { %249 = vpow2.f32 %v222_v57 }
  0x15   :  { %251 = vpow2.f32 %v223_v60 }
  0x16   :  { %v228_v1 = vpop.eup %227  ;;  %253 = vpow2.f32 %v224_v61 }
  0x17   :  { %v230_v4 = vpop.eup %229  ;;  %v124_v5 = vadd.f32 1.0, %v228_v1  ;;  %255 = vpow2.f32 %v225_v0 }
  0x18   :  { %v232_v6 = vpop.eup %231  ;;  %v125_v7 = vadd.f32 1.0, %v230_v4  ;;  %257 = vpow2.f32 %v226_v3 }
  0x19   :  { %v234_v8 = vpop.eup %233  ;;  %259 = vrcp.f32 %v124_v5  ;;  %v126_v9 = vadd.f32 1.0, %v232_v6 }
  0x1a   :  { %v236_v2 = vpop.eup %235  ;;  %261 = vrcp.f32 %v125_v7  ;;  %v127_v10 = vadd.f32 1.0, %v234_v8 }
  0x1b   :  { %v238_v11 = vpop.eup %237  ;;  %263 = vrcp.f32 %v126_v9  ;;  %v128_v12 = vadd.f32 1.0, %v236_v2 }
  0x1c   :  { %v240_v14 = vpop.eup %239  ;;  %265 = vrcp.f32 %v127_v10  ;;  %v129_v15 = vadd.f32 1.0, %v238_v11 }
  0x1d   :  { %v242_v16 = vpop.eup %241  ;;  %267 = vrcp.f32 %v128_v12  ;;  %v130_v17 = vadd.f32 1.0, %v240_v14 }
  0x1e   :  { %v244_v21 = vpop.eup %243  ;;  %269 = vrcp.f32 %v129_v15  ;;  %v131_v22 = vadd.f32 1.0, %v242_v16 }
  0x1f   :  { %v246_v23 = vpop.eup %245  ;;  %271 = vrcp.f32 %v130_v17  ;;  %v132_v24 = vadd.f32 1.0, %v244_v21 }
  0x20   :  { %v248_v25 = vpop.eup %247  ;;  %273 = vrcp.f32 %v131_v22  ;;  %v133_v29 = vadd.f32 1.0, %v246_v23 }
  0x21   :  { %v250_v30 = vpop.eup %249  ;;  %275 = vrcp.f32 %v132_v24  ;;  %v134_v31 = vadd.f32 1.0, %v248_v25 }
  0x22   :  { %v252_v32 = vpop.eup %251  ;;  %277 = vrcp.f32 %v133_v29  ;;  %v135_v33 = vadd.f32 1.0, %v250_v30 }
  0x23   :  { %v254_v34 = vpop.eup %253  ;;  %279 = vrcp.f32 %v134_v31  ;;  %v136_v36 = vadd.f32 1.0, %v252_v32 }
  0x24   :  { %v256_v37 = vpop.eup %255  ;;  %281 = vrcp.f32 %v135_v33  ;;  %v137_v38 = vadd.f32 1.0, %v254_v34 }
  0x25   :  { %v258_v39 = vpop.eup %257  ;;  %283 = vrcp.f32 %v136_v36  ;;  %v138_v40 = vadd.f32 1.0, %v256_v37 }
  0x26   :  { %v260_v41 = vpop.eup %259  ;;  %285 = vrcp.f32 %v137_v38  ;;  %v139_v42 = vadd.f32 1.0, %v258_v39 }
  0x27   :  { %v262_v43 = vpop.eup %261  ;;  %v172_v44 = vmul.f32 %v260_v41, %v347_v13  ;;  %287 = vrcp.f32 %v138_v40 }
  0x28   :  { %v264_v47 = vpop.eup %263  ;;  %v173_v51 = vmul.f32 %v262_v43, %v356_v18  ;;  %289 = vrcp.f32 %v139_v42 }
  0x29   :  { %v266_v52 = vpop.eup %265  ;;  %189 = vst.msk [vmem:[%s532_s3] sm:$0xff] %vm188_vm0, %v172_v44  ;;  %v174_v53 = vmul.f32 %v264_v47, %v359_v19 }
  0x2a   :  { %v268_v54 = vpop.eup %267  ;;  %190 = vst.msk [vmem:[%s532_s3 + $0x8] sm:$0xff] %vm188_vm0, %v173_v51  ;;  %v175_v13 = vmul.f32 %v266_v52, %v362_v20 }
  0x2b   :  { %v270_v56 = vpop.eup %269  ;;  %191 = vst.msk [vmem:[%s532_s3 + $0x10] sm:$0xff] %vm188_vm0, %v174_v53  ;;  %v176_v18 = vmul.f32 %v268_v54, %v376_v26 }
  0x2c   :  { %v272_v57 = vpop.eup %271  ;;  %192 = vst.msk [vmem:[%s532_s3 + $0x18] sm:$0xff] %vm188_vm0, %v175_v13  ;;  %v177_v19 = vmul.f32 %v270_v56, %v379_v27 }
  0x2d   :  { %v274_v58 = vpop.eup %273  ;;  %193 = vst.msk [vmem:[%s532_s3 + $0x20] sm:$0xff] %vm188_vm0, %v176_v18  ;;  %v178_v20 = vmul.f32 %v272_v57, %v382_v28 }
  0x2e   :  { %v276_v59 = vpop.eup %275  ;;  %194 = vst.msk [vmem:[%s532_s3 + $0x28] sm:$0xff] %vm188_vm0, %v177_v19  ;;  %v179_v26 = vmul.f32 %v274_v58, %v397_v35 }
  0x2f   :  { %v278_v60 = vpop.eup %277  ;;  %195 = vst.msk [vmem:[%s532_s3 + $0x30] sm:$0xff] %vm188_vm0, %v178_v20  ;;  %v180_v27 = vmul.f32 %v276_v59, %v409_v45 }
  0x30   :  { %v280_v61 = vpop.eup %279  ;;  %196 = vst.msk [vmem:[%s532_s3 + $0x38] sm:$0xff] %vm188_vm0, %v179_v26  ;;  %v181_v28 = vmul.f32 %v278_v60, %v412_v46 }
  0x31   :  { %v282_v0 = vpop.eup %281  ;;  %197 = vst.msk [vmem:[%s532_s3 + $0x40] sm:$0xff] %vm188_vm0, %v180_v27  ;;  %v182_v35 = vmul.f32 %v280_v61, %v416_v48 }
  0x32   :  { %v284_v3 = vpop.eup %283  ;;  %198 = vst.msk [vmem:[%s532_s3 + $0x48] sm:$0xff] %vm188_vm0, %v181_v28  ;;  %v183_v45 = vmul.f32 %v282_v0, %v419_v49 }
  0x33   :  { %v286_v1 = vpop.eup %285  ;;  %199 = vst.msk [vmem:[%s532_s3 + $0x50] sm:$0xff] %vm188_vm0, %v182_v35  ;;  %v184_v46 = vmul.f32 %v284_v3, %v422_v50 }
  0x34   :  { %v288_v4 = vpop.eup %287  ;;  %200 = vst.msk [vmem:[%s532_s3 + $0x58] sm:$0xff] %vm188_vm0, %v183_v45  ;;  %v185_v48 = vmul.f32 %v286_v1, %v433_v55 }
  0x35   :  { %v290_v5 = vpop.eup %289  ;;  %201 = vst.msk [vmem:[%s532_s3 + $0x60] sm:$0xff] %vm188_vm0, %v184_v46  ;;  %v186_v49 = vmul.f32 %v288_v4, %v442_v62 }
  0x36   :  { %202 = vst.msk [vmem:[%s532_s3 + $0x68] sm:$0xff] %vm188_vm0, %v185_v48  ;;  %v187_v50 = vmul.f32 %v290_v5, %v445_v63 }
  0x37   :  { %203 = vst.msk [vmem:[%s532_s3 + $0x70] sm:$0xff] %vm188_vm0, %v186_v49 }
  0x38   :  { %204 = vst.msk [vmem:[%s532_s3 + $0x78] sm:$0xff] %vm188_vm0, %v187_v50 }

</bundles_post_ra>
